<compile_context>
chip_gen: v7x
topology: tpu7x:2x2x1
jax: 0.10.0
libtpu: 0.0.40
codegen_flags: <defaults>
</compile_context>

<pallas_src>
import functools

import jax
import jax.numpy as jnp
import numpy as np
from jax import lax
from jax.experimental import pallas as pl
from jax.experimental.pallas import tpu as pltpu

KSIZE = 3
PAD = 1


def _sobel_weight(direction, out_channels, in_channels_per_group, ksize=KSIZE):
    """Fixed Sobel weight exactly like the PyTorch __init__ (reference only)."""
    w = np.zeros((out_channels, in_channels_per_group, ksize, ksize), np.float32)
    mid = ksize // 2
    if direction == "x":
        w[:, :, :, 0] = -1.0
        w[:, :, mid, 0] = -2.0
        w[:, :, :, -1] = 1.0
        w[:, :, mid, -1] = 2.0
    elif direction == "y":
        w[:, :, 0, :] = -1.0
        w[:, :, 0, mid] = -2.0
        w[:, :, -1, :] = 1.0
        w[:, :, -1, mid] = 2.0
    else:
        raise ValueError("Unrecognized direction")
    return jnp.asarray(w)


def _sobel_conv_kernel(x_ref, fb_ref, o_ref, *, N, Cin, H, W, direction):
    # x_ref:  (N*Cin, H*W)   whole batch; channels/batch in sublanes, spatial in lanes
    # fb_ref: (Cout, 2)      column 0 = sobel_factor, column 1 = bias
    # o_ref:  (N, Cout, H*W) lane-dense output
    HW = H * W
    R = N * Cin

    # Separable Sobel stencil S[kh, kw] = v[kh] * u[kw]  (compile-time consts).
    if direction == "x":
        u = (-1.0, 0.0, 1.0)   # along W (difference)
        v = (1.0, 2.0, 1.0)    # along H (smoothing)
    else:                      # direction == "y"
        u = (1.0, 2.0, 1.0)    # along W (smoothing)
        v = (-1.0, 0.0, 1.0)   # along H (difference)

    x = x_ref[...]             # (R, HW) f32

    # Border masks (zero padding): lane rolls of the flattened image wrap
    # across image-row / image boundaries, so those positions are masked to 0.
    flat = lax.broadcasted_iota(jnp.int32, (R, HW), 1)
    if (W & (W - 1)) == 0:
        w_idx = flat & (W - 1)       # W is a power of two: cheap AND, no modulo
    else:
        w_idx = flat % W
    has_left = w_idx > 0
    has_right = w_idx < (W - 1)
    has_up = flat >= W
    has_down = flat < (HW - W)

    # Horizontal pass: D(h,w) = u0*X(h,w-1) + u1*X(h,w) + u2*X(h,w+1).
    # roll(x, +1)[i] = x[i-1] (left neighbour); roll(x, HW-1)[i] = x[i+1].
    left = jnp.where(has_left, pltpu.roll(x, shift=1, axis=1), 0.0)
    right = jnp.where(has_right, pltpu.roll(x, shift=HW - 1, axis=1), 0.0)
    d = u[0] * left + u[2] * right
    if u[1] != 0.0:
        d = d + u[1] * x

    # Vertical pass: S(h,w) = v0*D(h-1,w) + v1*D(h,w) + v2*D(h+1,w).
    up = jnp.where(has_up, pltpu.roll(d, shift=W, axis=1), 0.0)
    down = jnp.where(has_down, pltpu.roll(d, shift=HW - W, axis=1), 0.0)
    s = v[0] * up + v[2] * down
    if v[1] != 0.0:
        s = s + v[1] * d             # (R, HW): Sobel response of every (n, c)

    fac = fb_ref[:, 0:1]             # (Cout, 1)
    bias = fb_ref[:, 1:2]            # (Cout, 1)

    # Rank-1 weight: per-image channel sum (sublane reduce on the XLU), then a
    # single broadcast FMA and a full-lane (Cout, HW) store per image.
    for n in range(N):
        sn = jnp.sum(s[n * Cin:(n + 1) * Cin, :], axis=0, keepdims=True)  # (1, HW)
        o_ref[n] = (fac * sn + bias).astype(o_ref.dtype)                  # (Cout, HW)


@functools.partial(jax.jit, static_argnums=(1,))
def sobel_conv2d(x_nchw, direction, sobel_factor, bias):
    """Forward pass of SobelConv2d for the module config (k=3, stride=1,
    padding=1, dilation=1, groups=1).  x_nchw: (N, Cin, H, W) float32."""
    # TODO(synk): general stride/dilation/groups and production-size images
    # (row-strip tiling with a 2-row halo, explicit vmem_limit_bytes sized for
    # v7x's 64 MiB VMEM) are not implemented; this specializes to the module's
    # instantiated configuration and small images that fit VMEM in one step.
    assert direction in ("x", "y")
    N, Cin, H, W = x_nchw.shape
    Cout = sobel_factor.shape[0]
    HW = H * W

    # Free reshapes only: (N, Cin, H, W) -> tile-aligned (N*Cin, HW) slab.
    x_flat = x_nchw.reshape(N * Cin, HW).astype(jnp.float32)
    fb = jnp.concatenate(
        [sobel_factor.reshape(Cout, 1), bias.reshape(Cout, 1)],
        axis=1).astype(jnp.float32)                          # (Cout, 2)

    kernel = functools.partial(
        _sobel_conv_kernel, N=N, Cin=Cin, H=H, W=W, direction=direction)

    out_flat = pl.pallas_call(
        kernel,
        out_shape=jax.ShapeDtypeStruct((N, Cout, HW), jnp.float32),
        in_specs=[
            pl.BlockSpec(memory_space=pltpu.MemorySpace.VMEM),   # whole (8, 256) slab
            pl.BlockSpec(memory_space=pltpu.MemorySpace.VMEM),   # (Cout, 2) fac+bias
        ],
        out_specs=pl.BlockSpec(memory_space=pltpu.MemorySpace.VMEM),
    )(x_flat, fb)

    # (N, Cout, H*W) -> (N, Cout, H, W): trailing-dim split, no data movement.
    return out_flat.reshape(N, Cout, H, W)


if __name__ == "__main__":
    key = jax.random.PRNGKey(0)
    kx, kf, kb = jax.random.split(key, 3)

    N, Cin, H, W = 2, 4, 16, 16
    Cout = 8

    x = jax.random.normal(kx, (N, Cin, H, W), jnp.float32)
    # Parameter shapes from __init__: sobel_factor (Cout,1,1,1), bias (Cout,).
    sobel_factor = jax.random.normal(kf, (Cout, 1, 1, 1), jnp.float32)
    bias = jax.random.normal(kb, (Cout,), jnp.float32)

    for direction in ("x", "y"):
        out = jax.block_until_ready(sobel_conv2d(x, direction, sobel_factor, bias))

        # Reference: XLA conv with the same effective weight (F.conv2d semantics).
        w_full = _sobel_weight(direction, Cout, Cin) * sobel_factor
        ref = lax.conv_general_dilated(
            x, w_full, window_strides=(1, 1), padding=((PAD, PAD), (PAD, PAD)),
            dimension_numbers=("NCHW", "OIHW", "NCHW"),
            precision=lax.Precision.HIGHEST,
        ) + bias.reshape(1, Cout, 1, 1)

        assert out.shape == (N, Cout, H, W)
        np.testing.assert_allclose(np.asarray(out), np.asarray(ref),
                                   rtol=1e-4, atol=1e-4)

    print("KERNEL_OK")
</pallas_src>

<mosaic_0001>
module attributes {stable_mosaic.version = 11 : i64} {
  func.func @_sobel_conv_kernel(%arg0: memref<8x256xf32, #tpu.memory_space<vmem>>, %arg1: memref<8x2xf32, #tpu.memory_space<vmem>>, %arg2: memref<2x8x256xf32, #tpu.memory_space<vmem>>) attributes {dimension_semantics = [], scalar_prefetch = 0 : i64, scratch_operands = 0 : i64, tpu.core_type = #tpu.core_type<tc>} {
    %c0 = arith.constant 0 : index
    %c0_0 = arith.constant 0 : index
    %0 = vector.load %arg0[%c0, %c0_0] : memref<8x256xf32, #tpu.memory_space<vmem>>, vector<8x256xf32>
    %1 = tpu.iota {dimensions = array<i32: 1>} : vector<8x256xi32>
    %c15_i32 = arith.constant 15 : i32
    %2 = vector.broadcast %c15_i32 : i32 to vector<8x256xi32>
    %3 = arith.andi %1, %2 : vector<8x256xi32>
    %c0_i32 = arith.constant 0 : i32
    %4 = vector.broadcast %c0_i32 : i32 to vector<8x256xi32>
    %5 = arith.cmpi sgt, %3, %4 : vector<8x256xi32>
    %c15_i32_1 = arith.constant 15 : i32
    %6 = vector.broadcast %c15_i32_1 : i32 to vector<8x256xi32>
    %7 = arith.cmpi slt, %3, %6 : vector<8x256xi32>
    %c16_i32 = arith.constant 16 : i32
    %8 = vector.broadcast %c16_i32 : i32 to vector<8x256xi32>
    %9 = arith.cmpi sge, %1, %8 : vector<8x256xi32>
    %c240_i32 = arith.constant 240 : i32
    %10 = vector.broadcast %c240_i32 : i32 to vector<8x256xi32>
    %11 = arith.cmpi slt, %1, %10 : vector<8x256xi32>
    %c1_i32 = arith.constant 1 : i32
    %12 = tpu.dynamic_rotate %0 by %c1_i32 dim 1 : vector<8x256xf32>, i32 -> vector<8x256xf32>
    %cst = arith.constant 0.000000e+00 : f32
    %13 = vector.broadcast %cst : f32 to vector<8x256xf32>
    %14 = arith.select %5, %12, %13 : vector<8x256xi1>, vector<8x256xf32>
    %c255_i32 = arith.constant 255 : i32
    %15 = tpu.dynamic_rotate %0 by %c255_i32 dim 1 : vector<8x256xf32>, i32 -> vector<8x256xf32>
    %cst_2 = arith.constant 0.000000e+00 : f32
    %16 = vector.broadcast %cst_2 : f32 to vector<8x256xf32>
    %17 = arith.select %7, %15, %16 : vector<8x256xi1>, vector<8x256xf32>
    %cst_3 = arith.constant -1.000000e+00 : f32
    %18 = vector.broadcast %cst_3 : f32 to vector<8x256xf32>
    %19 = arith.mulf %18, %14 : vector<8x256xf32>
    %cst_4 = arith.constant 1.000000e+00 : f32
    %20 = vector.broadcast %cst_4 : f32 to vector<8x256xf32>
    %21 = arith.mulf %20, %17 : vector<8x256xf32>
    %22 = arith.addf %19, %21 : vector<8x256xf32>
    %c16_i32_5 = arith.constant 16 : i32
    %23 = tpu.dynamic_rotate %22 by %c16_i32_5 dim 1 : vector<8x256xf32>, i32 -> vector<8x256xf32>
    %cst_6 = arith.constant 0.000000e+00 : f32
    %24 = vector.broadcast %cst_6 : f32 to vector<8x256xf32>
    %25 = arith.select %9, %23, %24 : vector<8x256xi1>, vector<8x256xf32>
    %c240_i32_7 = arith.constant 240 : i32
    %26 = tpu.dynamic_rotate %22 by %c240_i32_7 dim 1 : vector<8x256xf32>, i32 -> vector<8x256xf32>
    %cst_8 = arith.constant 0.000000e+00 : f32
    %27 = vector.broadcast %cst_8 : f32 to vector<8x256xf32>
    %28 = arith.select %11, %26, %27 : vector<8x256xi1>, vector<8x256xf32>
    %cst_9 = arith.constant 1.000000e+00 : f32
    %29 = vector.broadcast %cst_9 : f32 to vector<8x256xf32>
    %30 = arith.mulf %29, %25 : vector<8x256xf32>
    %cst_10 = arith.constant 1.000000e+00 : f32
    %31 = vector.broadcast %cst_10 : f32 to vector<8x256xf32>
    %32 = arith.mulf %31, %28 : vector<8x256xf32>
    %33 = arith.addf %30, %32 : vector<8x256xf32>
    %cst_11 = arith.constant 2.000000e+00 : f32
    %34 = vector.broadcast %cst_11 : f32 to vector<8x256xf32>
    %35 = arith.mulf %34, %22 : vector<8x256xf32>
    %36 = arith.addf %33, %35 : vector<8x256xf32>
    %c0_12 = arith.constant 0 : index
    %c0_13 = arith.constant 0 : index
    %37 = vector.load %arg1[%c0_12, %c0_13] : memref<8x2xf32, #tpu.memory_space<vmem>>, vector<8x1xf32>
    %c0_14 = arith.constant 0 : index
    %c1 = arith.constant 1 : index
    %38 = vector.load %arg1[%c0_14, %c1] : memref<8x2xf32, #tpu.memory_space<vmem>>, vector<8x1xf32>
    %39 = vector.extract_strided_slice %36 {offsets = [0, 0], sizes = [4, 256], strides = [1, 1]} : vector<8x256xf32> to vector<4x256xf32>
    %cst_15 = arith.constant dense<0.000000e+00> : vector<256xf32>
    %40 = vector.multi_reduction <add>, %39, %cst_15 [0] : vector<4x256xf32> to vector<256xf32>
    %41 = vector.shape_cast %40 : vector<256xf32> to vector<1x256xf32>
    %42 = vector.broadcast %37 : vector<8x1xf32> to vector<8x256xf32>
    %43 = vector.broadcast %41 : vector<1x256xf32> to vector<8x256xf32>
    %44 = arith.mulf %42, %43 : vector<8x256xf32>
    %45 = vector.broadcast %38 : vector<8x1xf32> to vector<8x256xf32>
    %46 = arith.addf %44, %45 : vector<8x256xf32>
    %c0_16 = arith.constant 0 : index
    %c0_17 = arith.constant 0 : index
    %c0_18 = arith.constant 0 : index
    %47 = vector.load %arg2[%c0_16, %c0_17, %c0_18] : memref<2x8x256xf32, #tpu.memory_space<vmem>>, vector<1x8x256xf32>
    %48 = vector.shape_cast %47 : vector<1x8x256xf32> to vector<8x256xf32>
    %49 = vector.shape_cast %46 : vector<8x256xf32> to vector<1x8x256xf32>
    tpu.vector_store %arg2[%c0_16, %c0_17, %c0_18], %49 {strides = array<i32>} : memref<2x8x256xf32, #tpu.memory_space<vmem>>, vector<1x8x256xf32>,
    %50 = vector.extract_strided_slice %36 {offsets = [4, 0], sizes = [4, 256], strides = [1, 1]} : vector<8x256xf32> to vector<4x256xf32>
    %cst_19 = arith.constant dense<0.000000e+00> : vector<256xf32>
    %51 = vector.multi_reduction <add>, %50, %cst_19 [0] : vector<4x256xf32> to vector<256xf32>
    %52 = vector.shape_cast %51 : vector<256xf32> to vector<1x256xf32>
    %53 = vector.broadcast %37 : vector<8x1xf32> to vector<8x256xf32>
    %54 = vector.broadcast %52 : vector<1x256xf32> to vector<8x256xf32>
    %55 = arith.mulf %53, %54 : vector<8x256xf32>
    %56 = vector.broadcast %38 : vector<8x1xf32> to vector<8x256xf32>
    %57 = arith.addf %55, %56 : vector<8x256xf32>
    %c1_20 = arith.constant 1 : index
    %c0_21 = arith.constant 0 : index
    %c0_22 = arith.constant 0 : index
    %58 = vector.load %arg2[%c1_20, %c0_21, %c0_22] : memref<2x8x256xf32, #tpu.memory_space<vmem>>, vector<1x8x256xf32>
    %59 = vector.shape_cast %58 : vector<1x8x256xf32> to vector<8x256xf32>
    %60 = vector.shape_cast %57 : vector<8x256xf32> to vector<1x8x256xf32>
    tpu.vector_store %arg2[%c1_20, %c0_21, %c0_22], %60 {strides = array<i32>} : memref<2x8x256xf32, #tpu.memory_space<vmem>>, vector<1x8x256xf32>,
    return
  }
}

</mosaic_0001>

<bundles_post_ra>
// kernel: sobel_conv2d.1
= control target key start
LH: loop header
LB: loop body
LE: loop exit
PB: predicated region body
PF: predicated region fallthrough
CT: control target
= control target key end

     0   :  { %s145_s11 = smov 127   ;;  %s146_s12 = smov 1   ;;  %v147_v2 = vmov 0   ;;  %v148_v3 = vmov 1   ;;  %v13_v4 = vlaneseq  ;;  %vm73_vm10 = vcmask 1043456   ;;  %s187_s0 = inlined_call_operand.vmem [shape: f32[8,256], index: 0, kind: input, shape index: {}]   ;;  %s188_s1 = inlined_call_operand.vmem [shape: f32[8,2], index: 1, kind: input, shape index: {}]   ;;  %s189_s2 = inlined_call_operand.vmem [shape: f32[2,8,256], index: 2, kind: output, shape index: {}]  }
   0x1   :  { %v11_v0 = vld [vmem:[%s187_s0] sm:$0xff]  ;;  %v12_v1 = vld [vmem:[%s187_s0 + $0x8] sm:$0xff]  ;;  %142 = vset.pattern.permute.xlu0 %v147_v2  ;;  %143 = vset.pattern.permute.xlu1 %v148_v3  ;;  %s149_s0 = smov 16   ;;  %s150_s15 = smov 112  }
   0x2   :  { %35 = vrot.lane.b32.xlu1 %v11_v0, %s145_s11  ;;  %26 = vrot.lane.b32.xlu0 %v11_v0, %s146_s12  ;;  %v14_v5 = vand.u32 127, %v13_v4  ;;  %v72_v25 = vld [vmem:[%s188_s1] sm:$0xff] }
   0x4   :  { %v15_v6 = vadd.s32 128, %v14_v5  ;;  %v16_v7 = vand.u32 15, %v14_v5  ;;  %vm39_vm0 = vcmp.lt.s32.totalorder %v14_v5, 127  ;;  %vm30_vm1 = vcmp.lt.s32.totalorder %v14_v5, 1 }
   0x5   :  { %vm52_vm6 = vcmp.lt.s32.totalorder %v14_v5, 16  ;;  %vm22_vm7 = vcmp.ge.s32.totalorder %v14_v5, 16  ;;  %vm61_vm8 = vcmp.lt.s32.totalorder %v14_v5, 112 }
   0x6   :  { %37 = vrot.lane.b32.xlu1 %v12_v1, %s145_s11  ;;  %28 = vrot.lane.b32.xlu0 %v12_v1, %s146_s12  ;;  %v17_v8 = vand.u32 15, %v15_v6  ;;  %vm18_vm2 = vcmp.gt.s32.totalorder %v16_v7, 0  ;;  %vm20_vm4 = vcmp.lt.s32.totalorder %v16_v7, 15  ;;  %vm25_vm9 = vcmp.lt.s32.totalorder %v15_v6, 240 }
   0x8   :  { %vm19_vm3 = vcmp.gt.s32.totalorder %v17_v8, 0  ;;  %vm21_vm5 = vcmp.lt.s32.totalorder %v17_v8, 15 }
  0x74   :  { %v36_v9 = vpop.permute.xlu1 %35  ;;  %v27_v10 = vpop.permute.xlu0 %26 }
  0x78   :  { %v38_v11 = vpop.permute.xlu1 %37  ;;  %v29_v12 = vpop.permute.xlu0 %28 }
  0x79   :  { %v40_v13 = vsel %vm39_vm0, %v36_v9, %v38_v11  ;;  %v41_v14 = vsel %vm39_vm0, %v38_v11, %v36_v9  ;;  %v31_v15 = vsel %vm30_vm1, %v27_v10, %v29_v12  ;;  %v32_v16 = vsel %vm30_vm1, %v29_v12, %v27_v10 }
  0x7a   :  { %v33_v17 = vsel %vm18_vm2, %v32_v16, 0.0  ;;  %v34_v18 = vsel %vm19_vm3, %v31_v15, 0.0  ;;  %v42_v21 = vsel %vm20_vm4, %v40_v13, 0.0  ;;  %v43_v22 = vsel %vm21_vm5, %v41_v14, 0.0 }
  0x7b   :  { %v44_v19 = vmul.f32 -1.0, %v33_v17  ;;  %v45_v20 = vmul.f32 -1.0, %v34_v18 }
  0x7d   :  { %v46_v23 = vadd.f32 %v44_v19, %v42_v21  ;;  %v47_v24 = vadd.f32 %v45_v20, %v43_v22 }
  0x7f   :  { %48 = vrot.lane.b32.xlu0 %v46_v23, %s149_s0  ;;  %50 = vrot.lane.b32.xlu1 %v47_v24, %s149_s0  ;;  %v68_v35 = vmul.f32 2.0, %v46_v23  ;;  %v69_v39 = vmul.f32 2.0, %v47_v24 }
  0x83   :  { %57 = vrot.lane.b32.xlu0 %v46_v23, %s150_s15  ;;  %59 = vrot.lane.b32.xlu1 %v47_v24, %s150_s15 }
  0x87   :  { %90 = vperm.xlu0 %142, %v72_v25   ;;  %96 = vperm.xlu1 %143, %v72_v25  }
  0x8b   :  { %144 = vset.pattern.permute.xlu0 %v148_v3 }
  0xf1   :  { %v49_v26 = vpop.permute.xlu0 %48  ;;  %v51_v27 = vpop.permute.xlu1 %50 }
  0xf2   :  { %v54_v28 = vsel %vm52_vm6, %v51_v27, %v49_v26  ;;  %v53_v34 = vsel %vm52_vm6, %v49_v26, %v51_v27 }
  0xf3   :  { %v55_v31 = vsel %vm22_vm7, %v54_v28, 0.0 }
  0xf5   :  { %v58_v29 = vpop.permute.xlu0 %57  ;;  %v60_v30 = vpop.permute.xlu1 %59 }
  0xf6   :  { %v62_v32 = vsel %vm61_vm8, %v58_v29, %v60_v30  ;;  %v63_v33 = vsel %vm61_vm8, %v60_v30, %v58_v29 }
  0xf7   :  { %v65_v36 = vsel %vm25_vm9, %v63_v33, 0.0  ;;  %v66_v37 = vadd.f32 %v62_v32, %v55_v31 }
  0xf8   :  { %v67_v38 = vadd.f32 %v65_v36, %v53_v34 }
  0xf9   :  { %v70_v40 = vadd.f32 %v68_v35, %v66_v37 }
  0xfa   :  { %v71_v41 = vadd.f32 %v69_v39, %v67_v38 }
  0xfb   :  { %v74_v42 = vsel %vm73_vm10, %v70_v40, 0.0  ;;  %v105_v43 = vrot.slane %v70_v40, 4 }
  0xfc   :  { %v75_v44 = vrot.slane %v74_v42, 4  ;;  %v81_v45 = vsel %vm73_vm10, %v71_v41, 0.0  ;;  %v106_v46 = vrot.slane %v71_v41, 4 }
  0xfd   :  { %v82_v47 = vrot.slane %v81_v45, 4  ;;  %v109_v48 = vsel %vm73_vm10, %v105_v43, 0.0 }
  0xfe   :  { %v76_v49 = vadd.f32 %v75_v44, %v74_v42  ;;  %v110_v50 = vrot.slane %v109_v48, 4  ;;  %v116_v51 = vsel %vm73_vm10, %v106_v46, 0.0 }
  0xff   :  { %v83_v52 = vadd.f32 %v82_v47, %v81_v45  ;;  %v117_v53 = vrot.slane %v116_v51, 4 }
 0x100   :  { %v77_v54 = vrot.slane %v76_v49, 2  ;;  %v111_v55 = vadd.f32 %v110_v50, %v109_v48 }
 0x101   :  { %v84_v56 = vrot.slane %v83_v52, 2  ;;  %v118_v57 = vadd.f32 %v117_v53, %v116_v51 }
 0x102   :  { %v78_v58 = vadd.f32 %v77_v54, %v76_v49  ;;  %v112_v59 = vrot.slane %v111_v55, 2 }
 0x103   :  { %v85_v60 = vadd.f32 %v84_v56, %v83_v52  ;;  %v119_v61 = vrot.slane %v118_v57, 2 }
 0x104   :  { %v79_v62 = vrot.slane %v78_v58, 1  ;;  %v113_v63 = vadd.f32 %v112_v59, %v111_v55 }
 0x105   :  { %v86_v0 = vrot.slane %v85_v60, 1  ;;  %v120_v1 = vadd.f32 %v119_v61, %v118_v57 }
 0x106   :  { %v91_v2 = vpop.permute.xlu0 %90  ;;  %v80_v3 = vadd.f32 %v79_v62, %v78_v58  ;;  %v114_v4 = vrot.slane %v113_v63, 1  ;;  %v97_v7 = vpop.permute.xlu1 %96 }
 0x107   :  { %v87_v5 = vadd.f32 %v86_v0, %v85_v60  ;;  %v121_v6 = vrot.slane %v120_v1, 1 }
 0x108   :  { %v93_v8 = vmul.f32 %v91_v2, %v80_v3  ;;  %v115_v9 = vadd.f32 %v114_v4, %v113_v63 }
 0x109   :  { %v94_v10 = vmul.f32 %v91_v2, %v87_v5  ;;  %v122_v11 = vadd.f32 %v121_v6, %v120_v1 }
 0x10a   :  { %v123_v12 = vmul.f32 %v115_v9, %v91_v2  ;;  %v99_v13 = vadd.f32 %v97_v7, %v93_v8 }
 0x10b   :  { %v124_v14 = vmul.f32 %v122_v11, %v91_v2  ;;  %v100_v15 = vadd.f32 %v97_v7, %v94_v10 }
 0x10c   :  { %101 = vst [vmem:[%s189_s2] sm:$0xff] %v99_v13  ;;  %v125_v16 = vadd.f32 %v123_v12, %v97_v7 }
 0x10d   :  { %102 = vst [vmem:[%s189_s2 + $0x8] sm:$0xff] %v100_v15  ;;  %v126_v17 = vadd.f32 %v124_v14, %v97_v7 }
 0x10e   :  { %134 = vst [vmem:[%s189_s2 + $0x10] sm:$0xff] %v125_v16 }
 0x10f   :  { %135 = vst [vmem:[%s189_s2 + $0x18] sm:$0xff] %v126_v17 }

</bundles_post_ra>
